<compile_context>
chip_gen: v7x
topology: tpu7x:2x2x1
jax: 0.10.0
libtpu: 0.0.40
codegen_flags: <defaults>
</compile_context>

<pallas_src>
import functools
import math

import jax
import jax.numpy as jnp
from jax.experimental import pallas as pl
from jax.experimental.pallas import tpu as pltpu


# ---------------------------------------------------------------------------
# Parameter setup (plain JAX glue): deterministic sinusoidal table
# ---------------------------------------------------------------------------
def make_positional_table(d_model: int, max_len: int = 5000) -> jnp.ndarray:
    """Returns pe of shape (max_len, 1, d_model), float32."""
    position = jnp.arange(0, max_len, dtype=jnp.float32)[:, None]          # (L, 1)
    div_term = jnp.exp(
        jnp.arange(0, d_model, 2, dtype=jnp.float32)
        * (-math.log(10000.0) / d_model)
    )                                                                       # (D/2,)
    angles = position * div_term                                            # (L, D/2)
    pe = jnp.zeros((max_len, d_model), dtype=jnp.float32)
    pe = pe.at[:, 0::2].set(jnp.sin(angles))
    pe = pe.at[:, 1::2].set(jnp.cos(angles))
    return pe[:, None, :]                                                   # (L, 1, D)


# ---------------------------------------------------------------------------
# Pallas kernels
# ---------------------------------------------------------------------------
def _broadcast_pe(pe_tile, batch: int):
    # pe_tile: (ts, D) -> (ts, batch*D) by repeating along the lane axis.
    # Matches the row-major flattening (ts, batch, D) -> (ts, batch*D).
    if batch == 1:
        return pe_tile
    return jnp.concatenate([pe_tile] * batch, axis=-1)


def _pe_add_kernel(x_ref, pe_ref, o_ref, *, batch: int):
    # x_ref/o_ref: (ts, B*D), pe_ref: (ts, D)
    o_ref[...] = x_ref[...] + _broadcast_pe(pe_ref[...], batch)


def _fmix32(h):
    # murmur3 32-bit finalizer (uint32 arithmetic wraps on overflow).
    h = h ^ (h >> 16)
    h = h * jnp.uint32(0x85EBCA6B)
    h = h ^ (h >> 13)
    h = h * jnp.uint32(0xC2B2AE35)
    h = h ^ (h >> 16)
    return h


def _pe_add_dropout_kernel(seed_ref, x_ref, pe_ref, o_ref, *,
                           batch: int, p: float, tile_s: int):
    # Training-mode path: add PE, then inverted dropout with keep prob 1-p.
    # Random bits come from a stateless hash of (global element index, seed),
    # so the mask is tiling-independent and needs no hardware PRNG state.
    # TODO(synk): torch's dropout RNG stream cannot be reproduced bit-exactly;
    # only the inverted-dropout semantics (keep prob, 1/(1-p) scaling) match.
    y = x_ref[...] + _broadcast_pe(pe_ref[...], batch)
    ts, bd = y.shape

    row0 = (pl.program_id(0) * tile_s).astype(jnp.uint32)
    rows = jax.lax.broadcasted_iota(jnp.int32, (ts, bd), 0).astype(jnp.uint32) + row0
    cols = jax.lax.broadcasted_iota(jnp.int32, (ts, bd), 1).astype(jnp.uint32)
    idx = rows * jnp.uint32(bd) + cols

    key = seed_ref[0].astype(jnp.uint32) * jnp.uint32(0x9E3779B9) + jnp.uint32(0x7F4A7C15)
    bits = _fmix32(idx ^ key)

    threshold = jnp.uint32(min(int(round(p * (2.0 ** 32))), 2 ** 32 - 1))
    keep = bits >= threshold
    scale = jnp.float32(1.0 / (1.0 - p))
    o_ref[...] = jnp.where(keep, y * scale, jnp.zeros_like(y))


# ---------------------------------------------------------------------------
# Wrapper
# ---------------------------------------------------------------------------
def positional_encoding_forward(
    x: jnp.ndarray,
    pe: jnp.ndarray,
    *,
    p: float = 0.1,
    training: bool = False,
    seed: int = 0,
) -> jnp.ndarray:
    """x: (S, B, D) float32; pe: (max_len, 1, D). Returns (S, B, D)."""
    S, B, D = x.shape
    BD = B * D

    # Lane-dense 2D views (row-major reshape is layout-preserving -> free).
    x2d = x.reshape(S, BD)
    pe2d = pe[:S, 0, :]                                   # (S, D)

    # VMEM-budgeted sequence tile: ~4 MiB x-block, sublane-aligned to 8.
    # Double-buffered x + out + pe tiles stay well under the 32 MiB limit
    # (and v7x's 64 MiB physical VMEM).
    itemsize = jnp.dtype(x.dtype).itemsize
    bytes_per_row = BD * itemsize
    target_bytes = 4 * 1024 * 1024
    tile_s = max(1, target_bytes // bytes_per_row)
    if tile_s >= S:
        tile_s = S                                        # full extent (small inputs)
    else:
        tile_s = max(8, (tile_s // 8) * 8)                # multiple of 8 sublanes
    grid = (pl.cdiv(S, tile_s),)                          # partial last block masked

    out_shape = jax.ShapeDtypeStruct((S, BD), x.dtype)
    cparams = pltpu.CompilerParams(
        dimension_semantics=("parallel",),                # megacore sharding on v7x
        vmem_limit_bytes=32 * 1024 * 1024,                # safe on v5e/v6e/v7x
    )

    if (not training) or p <= 0.0:
        out2d = pl.pallas_call(
            functools.partial(_pe_add_kernel, batch=B),
            out_shape=out_shape,
            grid=grid,
            in_specs=[
                pl.BlockSpec((tile_s, BD), lambda i: (i, 0)),
                pl.BlockSpec((tile_s, D), lambda i: (i, 0)),
            ],
            out_specs=pl.BlockSpec((tile_s, BD), lambda i: (i, 0)),
            compiler_params=cparams,
        )(x2d, pe2d)
        return out2d.reshape(S, B, D)

    if p >= 1.0:
        return jnp.zeros_like(x)

    seed_arr = jnp.array([seed], dtype=jnp.int32)
    kernel = functools.partial(
        _pe_add_dropout_kernel, batch=B, p=float(p), tile_s=tile_s)
    out2d = pl.pallas_call(
        kernel,
        out_shape=out_shape,
        grid_spec=pltpu.PrefetchScalarGridSpec(
            num_scalar_prefetch=1,
            grid=grid,
            in_specs=[
                pl.BlockSpec((tile_s, BD), lambda i, seed: (i, 0)),
                pl.BlockSpec((tile_s, D), lambda i, seed: (i, 0)),
            ],
            out_specs=pl.BlockSpec((tile_s, BD), lambda i, seed: (i, 0)),
        ),
        compiler_params=cparams,
    )(seed_arr, x2d, pe2d)
    return out2d.reshape(S, B, D)


# ---------------------------------------------------------------------------
# Reference (pure JAX) for correctness checks
# ---------------------------------------------------------------------------
def positional_encoding_ref(x, pe):
    return x + pe[: x.shape[0]]


if __name__ == "__main__":
    # Small shapes consistent with the module: (seq, batch, d_model)
    seq, batch, d_model = 8, 2, 32
    max_len = 64

    key = jax.random.PRNGKey(0)
    x = jax.random.normal(key, (seq, batch, d_model), dtype=jnp.float32)
    pe = make_positional_table(d_model, max_len)

    # Eval-mode forward (dropout is identity, matches torch .eval()).
    out = positional_encoding_forward(x, pe, training=False)
    out = jax.block_until_ready(out)
    ref = positional_encoding_ref(x, pe)
    assert out.shape == (seq, batch, d_model)
    assert jnp.allclose(out, ref, atol=1e-6, rtol=1e-6)

    # Training-mode forward (in-kernel inverted dropout).
    p = 0.1
    out_train = positional_encoding_forward(x, pe, training=True, p=p, seed=0)
    out_train = jax.block_until_ready(out_train)
    assert out_train.shape == (seq, batch, d_model)
    # Every output element is either dropped (0) or the PE-added value / (1-p).
    scaled = ref * (1.0 / (1.0 - p))
    ok = (out_train == 0) | jnp.isclose(out_train, scaled, atol=1e-5, rtol=1e-5)
    assert bool(jnp.all(ok))
    # Empirical keep-rate sanity check (loose bound for a small sample).
    keep_rate = float(jnp.mean((out_train != 0).astype(jnp.float32)))
    assert 0.75 <= keep_rate <= 1.0

    print("KERNEL_OK")
</pallas_src>

<mosaic_0001>
module attributes {stable_mosaic.version = 11 : i64} {
  func.func @_pe_add_kernel(%arg0: i32, %arg1: memref<8x64xf32, #tpu.memory_space<vmem>>, %arg2: memref<8x32xf32, #tpu.memory_space<vmem>>, %arg3: memref<8x64xf32, #tpu.memory_space<vmem>>) attributes {dimension_semantics = [#tpu.dimension_semantics<parallel>], iteration_bounds = array<i64: 1>, scalar_prefetch = 0 : i64, scratch_operands = 0 : i64, tpu.core_type = #tpu.core_type<tc>, window_params = [{transform_indices = @transform_0, window_bounds = array<i64: 8, 64>}, {transform_indices = @transform_1, window_bounds = array<i64: 8, 32>}, {transform_indices = @transform_2, window_bounds = array<i64: 8, 64>}]} {
    %c0 = arith.constant 0 : index
    %c0_0 = arith.constant 0 : index
    %0 = vector.load %arg1[%c0, %c0_0] : memref<8x64xf32, #tpu.memory_space<vmem>>, vector<8x64xf32>
    %c0_1 = arith.constant 0 : index
    %c0_2 = arith.constant 0 : index
    %1 = vector.load %arg2[%c0_1, %c0_2] : memref<8x32xf32, #tpu.memory_space<vmem>>, vector<8x32xf32>
    %2 = tpu.concatenate %1, %1 in 1 : vector<8x32xf32>, vector<8x32xf32> -> vector<8x64xf32>
    %3 = arith.addf %0, %2 : vector<8x64xf32>
    %c0_3 = arith.constant 0 : index
    %c0_4 = arith.constant 0 : index
    %4 = vector.load %arg3[%c0_3, %c0_4] : memref<8x64xf32, #tpu.memory_space<vmem>>, vector<8x64xf32>
    tpu.vector_store %arg3[%c0_3, %c0_4], %3 {strides = array<i32>} : memref<8x64xf32, #tpu.memory_space<vmem>>, vector<8x64xf32>,
    return
  }
  func.func @transform_0(%arg0: i32) -> (i32, i32) {
    %c0_i32 = arith.constant 0 : i32
    %c0_i32_0 = arith.constant 0 : i32
    return %arg0, %c0_i32 : i32, i32
  }
  func.func @transform_1(%arg0: i32) -> (i32, i32) {
    %c0_i32 = arith.constant 0 : i32
    %c0_i32_0 = arith.constant 0 : i32
    return %arg0, %c0_i32 : i32, i32
  }
  func.func @transform_2(%arg0: i32) -> (i32, i32) {
    %c0_i32 = arith.constant 0 : i32
    %c0_i32_0 = arith.constant 0 : i32
    return %arg0, %c0_i32 : i32, i32
  }
}

</mosaic_0001>

<bundles_post_ra>
// kernel: tpu_custom_call.1
= control target key start
LH: loop header
LB: loop body
LE: loop exit
PB: predicated region body
PF: predicated region fallthrough
CT: control target
= control target key end

     0   :  { %7 = vsyncpa [#allocation3], 0  ;;  %s194_s0 = inlined_call_operand.hbm [shape: f32[8,64], index: 0, kind: input, shape index: {}]   ;;  %s195_s1 = inlined_call_operand.hbm [shape: f32[8,32], index: 1, kind: input, shape index: {}]   ;;  %s196_s2 = inlined_call_operand.hbm [shape: f32[8,64], index: 2, kind: output, shape index: {}]  }
   0x1   :  { %8 = vsyncpa [#allocation6], 0 }
   0x2   :  { %9 = vsyncpa [#allocation4], 0  ;;  %s139_s9 = smov [#allocation2]   ;;  %s140_s11 = smov [#allocation5]  }
   0x3   :  { %s16_s10 = sshll.u32 %s139_s9, 4  ;;  %s26_s12 = sshll.u32 %s140_s11, 4  ;;  %s17_s10 = int_to_ptr.vmem [resolvable:$true] %s16_s10  ;;  %s27_s12 = int_to_ptr.vmem [resolvable:$true] %s26_s12 }
   0x4   :  { %s67_s15 = scalar_lea.hbm %s194_s0, 128 }
   0x5   :  { %p68_p0 = scmp.ne.s32.totalorder %s194_s0, %s67_s15  ;;  %p71_p1 = scmp.lt.u32.totalorder %s67_s15, %s194_s0 }
   0x7   :  { %p73_p2 = pnand %p71_p1, %p68_p0 }
   0x9   :  { %76 = shalt.err (!%p73_p2)
}
   0xa   :  { %s77_s20 = scalar_lea.vmem %s17_s10, 128  ;;  %p82_p4 = scmp.lt.s32.totalorder %s17_s10, %s17_s10 }
   0xb   :  { %p78_p3 = scmp.ne.s32.totalorder %s17_s10, %s77_s20  ;;  %p83_p5 = scmp.lt.s32.totalorder %s77_s20, %s77_s20 }
   0xd   :  { %p84_p6 = por %p83_p5, %p82_p4 }
   0xf   :  { %p85_p7 = pnand %p84_p6, %p78_p3 }
  0x11   :  { %88 = shalt.err (!%p85_p7)
}
  0x12   :  { %19 = dma.hbm_to_vmem [thread:$0]  %s194_s0, 128, %s17_s10, [#allocation3]  }
  0x13   :  { %s89_s25 = scalar_lea.hbm %s195_s1, 128 }
  0x14   :  { %p90_p8 = scmp.ne.s32.totalorder %s195_s1, %s89_s25  ;;  %p93_p9 = scmp.lt.u32.totalorder %s89_s25, %s195_s1 }
  0x16   :  { %p95_p10 = pnand %p93_p9, %p90_p8 }
  0x18   :  { %98 = shalt.err (!%p95_p10)
}
  0x19   :  { %s99_s30 = scalar_lea.vmem %s27_s12, 128  ;;  %p104_p12 = scmp.lt.s32.totalorder %s27_s12, %s27_s12 }
  0x1a   :  { %p100_p11 = scmp.ne.s32.totalorder %s27_s12, %s99_s30  ;;  %p105_p13 = scmp.lt.s32.totalorder %s99_s30, %s99_s30 }
  0x1c   :  { %p106_p0 = por %p105_p13, %p104_p12 }
  0x1e   :  { %p107_p1 = pnand %p106_p0, %p100_p11 }
  0x20   :  { %110 = shalt.err (!%p107_p1)
}
  0x21   :  { %29 = dma.hbm_to_vmem [thread:$0]  %s195_s1, 128, %s27_s12, [#allocation6]  }
  0x22   :  { %133 = dma.done.wait [#allocation3], 128  }
  0x23   :  { %134 = vsyncadd [#allocation3], 4294967168 }
  0x24   :  { %135 = dma.done.wait [#allocation6], 128  }
  0x25   :  { %136 = vsyncadd [#allocation6], 4294967168  ;;  %v37_v0 = vld [vmem:[#allocation5] sm:$0xff]  ;;  %s141_s4 = smov 32   ;;  %vm42_vm0 = vcmask 261120   ;;  %v36_v1 = vld [vmem:[#allocation2] sm:$0xff] }
  0x26   :  { %39 = vrot.lane.b32.xlu0 %v37_v0, %s141_s4  ;;  %s142_s5 = smov [#allocation7]   ;;  %vm45_vm1 = vcmask 523264  }
  0x27   :  { %s53_s6 = sshll.u32 %s142_s5, 4  ;;  %s54_s6 = int_to_ptr.vmem [resolvable:$true] %s53_s6 }
  0x28   :  { %s111_s7 = scalar_lea.vmem %s54_s6, 128  ;;  %p116_p3 = scmp.lt.s32.totalorder %s54_s6, %s54_s6 }
  0x29   :  { %p112_p2 = scmp.ne.s32.totalorder %s54_s6, %s111_s7  ;;  %p117_p4 = scmp.lt.s32.totalorder %s111_s7, %s111_s7 }
  0x2b   :  { %p118_p5 = por %p117_p4, %p116_p3 }
  0x2d   :  { %p119_p6 = pnand %p118_p5, %p112_p2 }
  0x98   :  { %v40_v2 = vpop.permute.xlu0 %39 }
  0x99   :  { %v43_v3 = vsel %vm42_vm0, %v37_v0, %v40_v2 }
  0x9a   :  { %v44_v4 = vadd.f32 %v43_v3, %v36_v1 }
  0x9c   :  { %46 = vst.msk [vmem:[#allocation7] sm:$0xff] %vm45_vm1, %v44_v4 }
  0x9d   :  { %122 = shalt.err (!%p119_p6)
}
  0x9e   :  { %s123_s9 = scalar_lea.hbm %s196_s2, 128 }
  0x9f   :  { %p124_p7 = scmp.ne.s32.totalorder %s196_s2, %s123_s9  ;;  %p127_p8 = scmp.lt.u32.totalorder %s123_s9, %s196_s2 }
  0xa1   :  { %p129_p9 = pnand %p127_p8, %p124_p7 }
  0xa3   :  { %132 = shalt.err (!%p129_p9)
}
  0xa4   :  { %56 = dma.vmem_to_hbm [thread:$0]  %s54_s6, 128, %s196_s2, [#allocation4]  }
  0xa5   :  { %137 = dma.done.wait [#allocation4], 128  }
  0xa6   :  { %138 = vsyncadd [#allocation4], 4294967168 }
  0xa7   :  { %60 = vsyncpa [#allocation3], 1 }
  0xa8   :  { %61 = vsyncpa [#allocation6], 1 }
  0xa9   :  { %62 = vsyncpa [#allocation4], 1 }

</bundles_post_ra>
